<compile_context>
chip_gen: v5e
topology: v5e:2x2
jax: 0.10.0
libtpu: 0.0.40
codegen_flags: <defaults>
</compile_context>

<pallas_src>
import jax
import jax.numpy as jnp
from jax.experimental import pallas as pl
from jax.experimental.pallas import tpu as pltpu


# ----------------------------- model config ---------------------------------
USER_NUM = 32             # item_vecs feature dim (interaction row over users)
ITEM_NUM = 32             # user_vecs feature dim (interaction row over items)
MLP_DIMS = [64, 32]       # mlp_dims;  mlp_dims[0]//2 = 32 per embedding
USER_MLP_DIMS = [32, 16]  # becomes [ITEM_NUM, 32, 16] after insert(0, item_num)
ITEM_MLP_DIMS = [32, 16]  # becomes [USER_NUM, 32, 16] after insert(0, user_num)
EMB = MLP_DIMS[0] // 2    # 32
DMF_DIM = USER_MLP_DIMS[-1]  # 16
BATCH = 16

D_IN = ITEM_NUM + USER_NUM                                   # 64  (x = [uv | iv])
S1 = MLP_DIMS[0] + USER_MLP_DIMS[0] + ITEM_MLP_DIMS[0]       # 128 (stage-1 out lanes)
S2 = 128                                                     # stage-2 out lanes (padded)
MLP_OUT = MLP_DIMS[1]                                        # 32


# ------------------------------- kernel -------------------------------------
def cfnet_kernel(x_ref, wmx_ref, aux_ref, out_ref):
    x = x_ref[...]                                           # (TB, 64) bf16

    w1 = wmx_ref[0:D_IN, :]                                  # (64, 128) bf16
    w2 = wmx_ref[D_IN:D_IN + S1, :]                          # (128, 128) bf16
    b1 = aux_ref[0:1, :]                                     # (1, 128) f32
    b2 = aux_ref[1:2, :]                                     # (1, 128) f32
    wpd = aux_ref[2:3, :][:, 0:DMF_DIM]                      # (1, 16)  pred w for dmf
    wpm = aux_ref[3:4, :][:, 0:MLP_OUT]                      # (1, 32)  pred w for mlp
    bp = aux_ref[4:5, :][:, 0:1]                             # (1, 1)

    # --- stage 1: one MXU pass -> [ue | ie | ul0 | il0] -----------------------
    a1 = jnp.dot(x, w1, preferred_element_type=jnp.float32) + b1       # (TB, 128) f32
    # ReLU only on the DMF-tower half (lanes >= 64); embeddings stay linear.
    lane = jax.lax.broadcasted_iota(jnp.int32, a1.shape, 1)
    a1 = jnp.where(lane >= D_IN, jnp.maximum(a1, 0.0), a1)

    # --- stage 2: one MXU pass (K=128) -> [mlp | ul1 | il1 | 0] ---------------
    a2 = jnp.dot(a1.astype(jnp.bfloat16), w2,
                 preferred_element_type=jnp.float32) + b2              # (TB, 128) f32
    a2 = jnp.maximum(a2, 0.0)

    mlp = a2[:, 0:MLP_OUT]                                             # (TB, 32)
    dmf = (a2[:, MLP_OUT:MLP_OUT + DMF_DIM] *
           a2[:, MLP_OUT + DMF_DIM:MLP_OUT + 2 * DMF_DIM])             # (TB, 16)

    # --- prediction: VPU multiplies + XLU lane reductions + sigmoid -----------
    logit = (jnp.sum(dmf * wpd, axis=-1, keepdims=True)
             + jnp.sum(mlp * wpm, axis=-1, keepdims=True)
             + bp)
    out_ref[...] = jax.nn.sigmoid(logit)


# ------------------------------ wrapper --------------------------------------
def cfnet_forward(user_vecs, item_vecs, packed, tb=None):
    wmx, aux = packed
    B = user_vecs.shape[0]
    tb = B if tb is None else tb
    assert B % tb == 0

    # wrapper-side concat implements torch.cat of the two input vectors;
    # bf16 operands cut MXU pass count and weight/activation DMA bytes.
    x = jnp.concatenate([user_vecs, item_vecs], axis=1).astype(jnp.bfloat16)
    d_in = x.shape[1]

    return pl.pallas_call(
        cfnet_kernel,
        out_shape=jax.ShapeDtypeStruct((B, 1), jnp.float32),
        grid_spec=pltpu.PrefetchScalarGridSpec(
            num_scalar_prefetch=0,
            grid=(B // tb,),
            in_specs=[
                pl.BlockSpec((tb, d_in), lambda i: (i, 0)),
                pl.BlockSpec(wmx.shape, lambda i: (0, 0)),
                pl.BlockSpec(aux.shape, lambda i: (0, 0)),
            ],
            out_specs=pl.BlockSpec((tb, 1), lambda i: (i, 0)),
        ),
        compiler_params=pltpu.CompilerParams(
            dimension_semantics=("parallel",)),
    )(x, wmx, aux)


# --------------------------- parameter init ----------------------------------
def linear_init(key, fan_in, fan_out):
    """Mimics torch.nn.Linear default init; returns (in, out) weight and (1, out) bias."""
    kw, kb = jax.random.split(key)
    bound = 1.0 / (fan_in ** 0.5)
    w = jax.random.uniform(kw, (fan_in, fan_out), jnp.float32, -bound, bound)
    b = jax.random.uniform(kb, (1, fan_out), jnp.float32, -bound, bound)
    return w, b


def make_params(key):
    """Original (unfused) CFNet parameters, (in,out)-layout weights."""
    keys = jax.random.split(key, 8)

    weu, beu = linear_init(keys[0], ITEM_NUM, EMB)                       # embed_user
    wei, bei = linear_init(keys[1], USER_NUM, EMB)                       # embed_item
    wm, bm = linear_init(keys[2], MLP_DIMS[0], MLP_DIMS[1])              # mlp layer 0
    wu0, bu0 = linear_init(keys[3], ITEM_NUM, USER_MLP_DIMS[0])          # user_mlp 0
    wu1, bu1 = linear_init(keys[4], USER_MLP_DIMS[0], USER_MLP_DIMS[1])  # user_mlp 1
    wi0, bi0 = linear_init(keys[5], USER_NUM, ITEM_MLP_DIMS[0])          # item_mlp 0
    wi1, bi1 = linear_init(keys[6], ITEM_MLP_DIMS[0], ITEM_MLP_DIMS[1])  # item_mlp 1
    wp, bp = linear_init(keys[7], MLP_DIMS[-1] + DMF_DIM, 1)             # pred layer

    return dict(weu=weu, beu=beu, wei=wei, bei=bei, wm=wm, bm=bm,
                wu0=wu0, bu0=bu0, wu1=wu1, bu1=bu1,
                wi0=wi0, bi0=bi0, wi1=wi1, bi1=bi1,
                wp=wp, bp=bp)


def pack_params(p):
    """Pack the 11 tensors into two lane-aligned slabs (wrapper side, once)."""
    f32 = jnp.float32

    # Stage-1 weight: x lanes [uv(0:32) | iv(32:64)]  ->  [ue | ie | ul0 | il0]
    w1 = jnp.zeros((D_IN, S1), f32)
    w1 = w1.at[0:ITEM_NUM, 0:EMB].set(p["weu"])
    w1 = w1.at[ITEM_NUM:D_IN, EMB:2 * EMB].set(p["wei"])
    w1 = w1.at[0:ITEM_NUM, 2 * EMB:2 * EMB + USER_MLP_DIMS[0]].set(p["wu0"])
    w1 = w1.at[ITEM_NUM:D_IN, 2 * EMB + USER_MLP_DIMS[0]:S1].set(p["wi0"])
    b1 = jnp.concatenate([p["beu"], p["bei"], p["bu0"], p["bi0"]], axis=1)  # (1,128)

    # Stage-2 weight: a1 lanes [emb(0:64) | ul0(64:96) | il0(96:128)]
    #              -> a2 lanes [mlp(0:32) | ul1(32:48) | il1(48:64) | 0-pad]
    w2 = jnp.zeros((S1, S2), f32)
    w2 = w2.at[0:MLP_DIMS[0], 0:MLP_OUT].set(p["wm"])
    w2 = w2.at[MLP_DIMS[0]:MLP_DIMS[0] + 32, MLP_OUT:MLP_OUT + DMF_DIM].set(p["wu1"])
    w2 = w2.at[MLP_DIMS[0] + 32:S1, MLP_OUT + DMF_DIM:MLP_OUT + 2 * DMF_DIM].set(p["wi1"])
    b2 = jnp.zeros((1, S2), f32)
    b2 = b2.at[:, 0:MLP_OUT].set(p["bm"])
    b2 = b2.at[:, MLP_OUT:MLP_OUT + DMF_DIM].set(p["bu1"])
    b2 = b2.at[:, MLP_OUT + DMF_DIM:MLP_OUT + 2 * DMF_DIM].set(p["bi1"])

    # bf16 slab for MXU operands (f32 accumulation kept in-kernel).
    wmx = jnp.concatenate([w1, w2], axis=0).astype(jnp.bfloat16)        # (192, 128)

    # f32 slab for biases + prediction layer (elementwise path stays f32).
    aux = jnp.zeros((8, 128), f32)
    aux = aux.at[0:1, :].set(b1)
    aux = aux.at[1:2, :].set(b2)
    aux = aux.at[2, 0:DMF_DIM].set(p["wp"][0:DMF_DIM, 0])               # wpd
    aux = aux.at[3, 0:MLP_OUT].set(p["wp"][DMF_DIM:DMF_DIM + MLP_OUT, 0])  # wpm
    aux = aux.at[4, 0].set(p["bp"][0, 0])                               # bp

    return wmx, aux


# --------------------------- pure-JAX reference -------------------------------
def cfnet_reference(user_vecs, item_vecs, p):
    ue = user_vecs @ p["weu"] + p["beu"]
    ie = item_vecs @ p["wei"] + p["bei"]
    mlp = jnp.maximum(jnp.concatenate([ue, ie], axis=1) @ p["wm"] + p["bm"], 0.0)
    ul = jnp.maximum(user_vecs @ p["wu0"] + p["bu0"], 0.0)
    ul = jnp.maximum(ul @ p["wu1"] + p["bu1"], 0.0)
    il = jnp.maximum(item_vecs @ p["wi0"] + p["bi0"], 0.0)
    il = jnp.maximum(il @ p["wi1"] + p["bi1"], 0.0)
    dmf = ul * il
    pred_in = jnp.concatenate([dmf, mlp], axis=1)
    return jax.nn.sigmoid(pred_in @ p["wp"] + p["bp"])


# --------------------------------- main ---------------------------------------
if __name__ == "__main__":
    key = jax.random.PRNGKey(0)
    k_uv, k_iv, k_p = jax.random.split(key, 3)

    # user_vecs: each user's interaction row over items; item_vecs: over users.
    user_vecs = jax.random.uniform(k_uv, (BATCH, ITEM_NUM), jnp.float32)
    item_vecs = jax.random.uniform(k_iv, (BATCH, USER_NUM), jnp.float32)

    params = make_params(k_p)
    packed = pack_params(params)

    out = cfnet_forward(user_vecs, item_vecs, packed)   # TB=BATCH -> grid=(1,)
    out = jax.block_until_ready(out)

    ref = cfnet_reference(user_vecs, item_vecs, params)
    assert out.shape == (BATCH, 1)
    # bf16 MXU operands (f32 accumulation) -> loosened tolerance per review.
    assert jnp.allclose(out, ref, atol=3e-2, rtol=3e-2), "mismatch vs JAX reference"

    print("KERNEL_OK")
</pallas_src>

<mosaic_0001>
module attributes {stable_mosaic.version = 11 : i64} {
  func.func @cfnet_kernel(%arg0: i32, %arg1: memref<16x64xbf16, #tpu.memory_space<vmem>>, %arg2: memref<192x128xbf16, #tpu.memory_space<vmem>>, %arg3: memref<8x128xf32, #tpu.memory_space<vmem>>, %arg4: memref<16x1xf32, #tpu.memory_space<vmem>>) attributes {dimension_semantics = [#tpu.dimension_semantics<parallel>], iteration_bounds = array<i64: 1>, scalar_prefetch = 0 : i64, scratch_operands = 0 : i64, tpu.core_type = #tpu.core_type<tc>, window_params = [{transform_indices = @transform_0, window_bounds = array<i64: 16, 64>}, {pipeline_mode = #tpu.pipeline_mode<synchronous>, transform_indices = @transform_1, window_bounds = array<i64: 192, 128>}, {pipeline_mode = #tpu.pipeline_mode<synchronous>, transform_indices = @transform_2, window_bounds = array<i64: 8, 128>}, {transform_indices = @transform_3, window_bounds = array<i64: 16, 1>}]} {
    %c0 = arith.constant 0 : index
    %c0_0 = arith.constant 0 : index
    %0 = vector.load %arg1[%c0, %c0_0] : memref<16x64xbf16, #tpu.memory_space<vmem>>, vector<16x64xbf16>
    %c0_1 = arith.constant 0 : index
    %c0_2 = arith.constant 0 : index
    %1 = vector.load %arg2[%c0_1, %c0_2] : memref<192x128xbf16, #tpu.memory_space<vmem>>, vector<64x128xbf16>
    %c64 = arith.constant 64 : index
    %c0_3 = arith.constant 0 : index
    %2 = vector.load %arg2[%c64, %c0_3] : memref<192x128xbf16, #tpu.memory_space<vmem>>, vector<128x128xbf16>
    %c0_4 = arith.constant 0 : index
    %c0_5 = arith.constant 0 : index
    %3 = vector.load %arg3[%c0_4, %c0_5] : memref<8x128xf32, #tpu.memory_space<vmem>>, vector<1x128xf32>
    %c1 = arith.constant 1 : index
    %c0_6 = arith.constant 0 : index
    %4 = vector.load %arg3[%c1, %c0_6] : memref<8x128xf32, #tpu.memory_space<vmem>>, vector<1x128xf32>
    %c2 = arith.constant 2 : index
    %c0_7 = arith.constant 0 : index
    %5 = vector.load %arg3[%c2, %c0_7] : memref<8x128xf32, #tpu.memory_space<vmem>>, vector<1x128xf32>
    %6 = vector.extract_strided_slice %5 {offsets = [0, 0], sizes = [1, 16], strides = [1, 1]} : vector<1x128xf32> to vector<1x16xf32>
    %c3 = arith.constant 3 : index
    %c0_8 = arith.constant 0 : index
    %7 = vector.load %arg3[%c3, %c0_8] : memref<8x128xf32, #tpu.memory_space<vmem>>, vector<1x128xf32>
    %8 = vector.extract_strided_slice %7 {offsets = [0, 0], sizes = [1, 32], strides = [1, 1]} : vector<1x128xf32> to vector<1x32xf32>
    %c4 = arith.constant 4 : index
    %c0_9 = arith.constant 0 : index
    %9 = vector.load %arg3[%c4, %c0_9] : memref<8x128xf32, #tpu.memory_space<vmem>>, vector<1x128xf32>
    %10 = vector.extract_strided_slice %9 {offsets = [0, 0], sizes = [1, 1], strides = [1, 1]} : vector<1x128xf32> to vector<1x1xf32>
    %cst = arith.constant dense<0.000000e+00> : vector<16x128xf32>
    %11 = tpu.matmul %0, %1, %cst {dimension_numbers = #tpu.dot_dimension_numbers<[1], [0], [0], [1], [0, 0, 1, 1], [], []>} : vector<16x64xbf16>, vector<64x128xbf16>, vector<16x128xf32> -> vector<16x128xf32>
    %12 = vector.broadcast %3 : vector<1x128xf32> to vector<16x128xf32>
    %13 = arith.addf %11, %12 : vector<16x128xf32>
    %14 = tpu.iota {dimensions = array<i32: 1>} : vector<16x128xi32>
    %c64_i32 = arith.constant 64 : i32
    %15 = vector.broadcast %c64_i32 : i32 to vector<16x128xi32>
    %16 = arith.cmpi sge, %14, %15 : vector<16x128xi32>
    %cst_10 = arith.constant 0.000000e+00 : f32
    %17 = vector.broadcast %cst_10 : f32 to vector<16x128xf32>
    %18 = arith.maximumf %13, %17 : vector<16x128xf32>
    %19 = arith.select %16, %18, %13 : vector<16x128xi1>, vector<16x128xf32>
    %20 = arith.truncf %19 : vector<16x128xf32> to vector<16x128xbf16>
    %cst_11 = arith.constant dense<0.000000e+00> : vector<16x128xf32>
    %21 = tpu.matmul %20, %2, %cst_11 {dimension_numbers = #tpu.dot_dimension_numbers<[1], [0], [0], [1], [0, 0, 1, 1], [], []>} : vector<16x128xbf16>, vector<128x128xbf16>, vector<16x128xf32> -> vector<16x128xf32>
    %22 = vector.broadcast %4 : vector<1x128xf32> to vector<16x128xf32>
    %23 = arith.addf %21, %22 : vector<16x128xf32>
    %cst_12 = arith.constant 0.000000e+00 : f32
    %24 = vector.broadcast %cst_12 : f32 to vector<16x128xf32>
    %25 = arith.maximumf %23, %24 : vector<16x128xf32>
    %26 = vector.extract_strided_slice %25 {offsets = [0, 0], sizes = [16, 32], strides = [1, 1]} : vector<16x128xf32> to vector<16x32xf32>
    %27 = vector.extract_strided_slice %25 {offsets = [0, 32], sizes = [16, 16], strides = [1, 1]} : vector<16x128xf32> to vector<16x16xf32>
    %28 = vector.extract_strided_slice %25 {offsets = [0, 48], sizes = [16, 16], strides = [1, 1]} : vector<16x128xf32> to vector<16x16xf32>
    %29 = arith.mulf %27, %28 : vector<16x16xf32>
    %30 = vector.broadcast %6 : vector<1x16xf32> to vector<16x16xf32>
    %31 = arith.mulf %29, %30 : vector<16x16xf32>
    %cst_13 = arith.constant dense<0.000000e+00> : vector<16xf32>
    %32 = vector.multi_reduction <add>, %31, %cst_13 [1] : vector<16x16xf32> to vector<16xf32>
    %33 = vector.shape_cast %32 : vector<16xf32> to vector<16x1xf32>
    %34 = vector.broadcast %8 : vector<1x32xf32> to vector<16x32xf32>
    %35 = arith.mulf %26, %34 : vector<16x32xf32>
    %cst_14 = arith.constant dense<0.000000e+00> : vector<16xf32>
    %36 = vector.multi_reduction <add>, %35, %cst_14 [1] : vector<16x32xf32> to vector<16xf32>
    %37 = vector.shape_cast %36 : vector<16xf32> to vector<16x1xf32>
    %38 = arith.addf %33, %37 : vector<16x1xf32>
    %39 = vector.broadcast %10 : vector<1x1xf32> to vector<16x1xf32>
    %40 = arith.addf %38, %39 : vector<16x1xf32>
    %41 = arith.negf %40 : vector<16x1xf32>
    %42 = math.exp %41 : vector<16x1xf32>
    %cst_15 = arith.constant 1.000000e+00 : f32
    %43 = vector.broadcast %cst_15 : f32 to vector<16x1xf32>
    %44 = arith.addf %43, %42 : vector<16x1xf32>
    %45 = arith.divf %43, %44 : vector<16x1xf32>
    %c0_16 = arith.constant 0 : index
    %c0_17 = arith.constant 0 : index
    %46 = vector.load %arg4[%c0_16, %c0_17] : memref<16x1xf32, #tpu.memory_space<vmem>>, vector<16x1xf32>
    tpu.vector_store %arg4[%c0_16, %c0_17], %45 {strides = array<i32>} : memref<16x1xf32, #tpu.memory_space<vmem>>, vector<16x1xf32>,
    return
  }
  func.func @transform_0(%arg0: i32) -> (i32, i32) {
    %c0_i32 = arith.constant 0 : i32
    %c0_i32_0 = arith.constant 0 : i32
    return %arg0, %c0_i32 : i32, i32
  }
  func.func @transform_1(%arg0: i32) -> (i32, i32) {
    %c0_i32 = arith.constant 0 : i32
    %c0_i32_0 = arith.constant 0 : i32
    %c0_i32_1 = arith.constant 0 : i32
    return %c0_i32, %c0_i32_0 : i32, i32
  }
  func.func @transform_2(%arg0: i32) -> (i32, i32) {
    %c0_i32 = arith.constant 0 : i32
    %c0_i32_0 = arith.constant 0 : i32
    %c0_i32_1 = arith.constant 0 : i32
    return %c0_i32, %c0_i32_0 : i32, i32
  }
  func.func @transform_3(%arg0: i32) -> (i32, i32) {
    %c0_i32 = arith.constant 0 : i32
    %c0_i32_0 = arith.constant 0 : i32
    return %arg0, %c0_i32 : i32, i32
  }
}

</mosaic_0001>

<bundles_post_ra>
// kernel: tpu_custom_call.1
= control target key start
LH: loop header
LB: loop body
LE: loop exit
PB: predicated region body
PF: predicated region fallthrough
CT: control target
= control target key end

     0   :  { %8 = vsyncpa [#allocation3], 0  ;;  %s516_s0 = inlined_call_operand.hbm [shape: bf16[16,64], index: 0, kind: input, shape index: {}]   ;;  %s517_s1 = inlined_call_operand.hbm [shape: bf16[192,128], index: 1, kind: input, shape index: {}]   ;;  %s518_s2 = inlined_call_operand.hbm [shape: f32[8,128], index: 2, kind: input, shape index: {}]   ;;  %s519_s3 = inlined_call_operand.vmem [shape: f32[16,1], index: 3, kind: output, shape index: {}]  }
   0x1   :  { %9 = vsyncpa [#allocation5], 0  ;;  %s27_s14 = sshll.u32 %s517_s1, 4  ;;  %s471_s15 = smov [#allocation4]   ;;  %s28_s14 = int_to_ptr.hbm [resolvable:$true] %s27_s14 }
   0x2   :  { %s29_s16 = sshll.u32 %s471_s15, 4  ;;  %s14_s19 = sshll.u32 %s516_s0, 4  ;;  %s30_s16 = int_to_ptr.vmem [resolvable:$true] %s29_s16  ;;  %s15_s19 = int_to_ptr.hbm [resolvable:$true] %s14_s19 }
   0x3   :  { %s472_s20 = smov 64   ;;  %s473_s21 = smov 4  }
   0x4   :  { %35 = dma.hbm_to_vmem [thread:$0]  %s28_s14, 1536, %s30_s16, [#allocation5], %s472_s20, %s472_s20, %s473_s21  }
   0x5   :  { %s474_s22 = smov [#allocation2]   ;;  %s41_s26 = sshll.u32 %s518_s2, 4  ;;  %s42_s26 = int_to_ptr.hbm [resolvable:$true] %s41_s26 }
   0x6   :  { %s16_s23 = sshll.u32 %s474_s22, 4  ;;  %s475_s1 = smov [#allocation6]   ;;  %s17_s23 = int_to_ptr.vmem [resolvable:$true] %s16_s23 }
   0x7   :  { %22 = dma.hbm_to_vmem [thread:$0]  %s15_s19, 128, %s17_s23, [#allocation3], %s472_s20, %s472_s20, %s473_s21  }
   0x8   :  { %s43_s27 = sshll.u32 %s475_s1, 4  ;;  %s44_s27 = int_to_ptr.vmem [resolvable:$true] %s43_s27 }
   0x9   :  { %46 = dma.hbm_to_vmem [thread:$0]  %s42_s26, 128, %s44_s27, [#allocation5]  }
   0xa   :  { %467 = dma.done.wait [#allocation3], 128  }
   0xb   :  { %468 = vsyncadd [#allocation3], 4294967168 }
   0xc   :  { %469 = dma.done.wait [#allocation5], 1664  }
   0xd   :  { %470 = vsyncadd [#allocation5], 4294965632  ;;  %v365_v0 = vld [vmem:[#allocation4 + $0x18] sm:$0xff]  ;;  %v364_v2 = vld [vmem:[#allocation4 + $0x10] sm:$0xff]  ;;  %vm121_vm0 = vcmask 523264   ;;  %v139_v15 = vlaneseq  ;;  %s476_s0 = smov 32  }
   0xe   :  { %v373_v1 = vld [vmem:[#allocation4 + $0x58] sm:$0xff]  ;;  %129 = vmatpush.bf16.msra.mxu0 %v365_v0  ;;  %v372_v3 = vld [vmem:[#allocation4 + $0x50] sm:$0xff]  ;;  %v363_v4 = vld [vmem:[#allocation4 + $0x8] sm:$0xff]  ;;  %s477_s2 = smov 112   ;;  %vm247_vm2 = vcmask 261120   ;;  %s478_s28 = smov 96  }
   0xf   :  { %196 = vmatpush.bf16.msra.mxu1 %v373_v1  ;;  %v371_v5 = vld [vmem:[#allocation4 + $0x48] sm:$0xff]  ;;  %v362_v6 = vld [vmem:[#allocation4] sm:$0xff]  ;;  %v361_v8 = vld [vmem:[#allocation2] sm:$0xff]  ;;  %v140_v17 = vand.u32 127, %v139_v15  ;;  %vm237_vm3 = vcmask 130048   ;;  %vm297_vm6 = vcmask 7168  }
  0x10   :  { %v370_v7 = vld [vmem:[#allocation4 + $0x40] sm:$0xff]  ;;  %v369_v9 = vld [vmem:[#allocation4 + $0x38] sm:$0xff]  ;;  %v368_v10 = vld [vmem:[#allocation4 + $0x30] sm:$0xff] }
  0x11   :  { %v367_v11 = vld [vmem:[#allocation4 + $0x28] sm:$0xff]  ;;  %v366_v12 = vld [vmem:[#allocation4 + $0x20] sm:$0xff]  ;;  %vm141_vm1 = vcmp.ge.s32.totalorder %v140_v17, 64 }
  0x12   :  { %130 = vmatpush.bf16.msra.mxu0 %v364_v2  ;;  %v382_v14 = vld [vmem:[#allocation6] ss:$0 sm:$0xff]  ;;  %v384_v25 = vld [vmem:[#allocation6 + $0x2] ss:$0 sm:$0xff]  ;;  %v383_v26 = vld [vmem:[#allocation6 + $0x1] ss:$0 sm:$0xff] }
  0x13   :  { %197 = vmatpush.bf16.msra.mxu1 %v372_v3  ;;  %224 = vrot.lane.b32.xlu1 %v384_v25, %s476_s0  ;;  %v385_v33 = vld [vmem:[#allocation6 + $0x3] ss:$0 sm:$0xff]  ;;  %v386_v49 = vld [vmem:[#allocation6 + $0x4] ss:$0 sm:$0xff] }
  0x16   :  { %131 = vmatpush.bf16.msra.mxu0 %v363_v4 }
  0x17   :  { %198 = vmatpush.bf16.msra.mxu1 %v371_v5 }
  0x1a   :  { %132 = vmatpush.bf16.msra.mxu0 %v362_v6 }
  0x1b   :  { %199 = vmatpush.bf16.msra.mxu1 %v370_v7 }
  0x1d   :  { %326 = vmatmul.msk.bf16.vlgmr.msra.gmra.mxu0 %vm121_vm0, %v361_v8 }
  0x1f   :  { %200 = vmatpush.bf16.msra.mxu1 %v369_v9 }
  0x23   :  { %201 = vmatpush.bf16.msra.mxu1 %v368_v10 }
  0x27   :  { %202 = vmatpush.bf16.msra.mxu1 %v367_v11 }
  0x2b   :  { %203 = vmatpush.bf16.msra.mxu1 %v366_v12 }
  0x85   :  { %v225_v37 = vpop.permute.xlu1 %224 }
  0x9a   :  { %v134_v13 = vpop.f32.mrf.mxu0 }
  0x9b   :  { %v135_v16 = vadd.f32 %v382_v14, %v134_v13 }
  0x9d   :  { %v142_v19 = vmax.f32 %v135_v16, 0.0 }
  0x9f   :  { %v144_v22 = vsel %vm141_vm1, %v142_v19, %v135_v16 }
  0xa2   :  { %v136_v18 = vpop.f32.mrf.mxu0 }
  0xa3   :  { %v137_v20 = vadd.f32 %v382_v14, %v136_v18 }
  0xa5   :  { %v143_v21 = vmax.f32 %v137_v20, 0.0 }
  0xa7   :  { %v145_v23 = vsel %vm141_vm1, %v143_v21, %v137_v20 }
  0xa8   :  { %v146_v24 = vpack.c.bf16 %v145_v23, %v144_v22 }
  0xaa   :  { %204 = vmatmul.bf16.vlgmr.msra.gmra.mxu1 %v146_v24 }
 0x127   :  { %v205_v27 = vpop.f32.mrf.mxu1 }
 0x128   :  { %v206_v28 = vadd.f32 %v383_v26, %v205_v27 }
 0x12a   :  { %v210_v29 = vmax.f32 %v206_v28, 0.0 }
 0x12c   :  { %214 = vrot.lane.b32.xlu0 %v210_v29, %s477_s2  ;;  %v245_v43 = vmul.f32 %v385_v33, %v210_v29 }
 0x12e   :  { %v248_v44 = vsel %vm247_vm2, %v245_v43, 0.0 }
 0x12f   :  { %v207_v30 = vpop.f32.mrf.mxu1 }
 0x130   :  { %v208_v31 = vadd.f32 %v383_v26, %v207_v30 }
 0x132   :  { %v211_v32 = vmax.f32 %v208_v31, 0.0 }
 0x134   :  { %216 = vrot.lane.b32.xlu0 %v211_v32, %s477_s2  ;;  %v246_v34 = vmul.f32 %v385_v33, %v211_v32 }
 0x136   :  { %v251_v35 = vsel %vm247_vm2, %v246_v34, 0.0 }
 0x19e   :  { %v215_v36 = vpop.permute.xlu0 %214 }
 0x19f   :  { %v220_v38 = vmul.f32 %v215_v36, %v210_v29 }
 0x1a1   :  { %v227_v39 = vmul.f32 %v225_v37, %v220_v38 }
 0x1a3   :  { %231 = vrot.lane.b32.xlu1 %v227_v39, %s478_s28 }
 0x1a6   :  { %v217_v40 = vpop.permute.xlu0 %216 }
 0x1a7   :  { %v221_v41 = vmul.f32 %v217_v40, %v211_v32 }
 0x1a9   :  { %v228_v42 = vmul.f32 %v225_v37, %v221_v41 }
 0x1ab   :  { %233 = vrot.lane.b32.xlu2 %v228_v42, %s478_s28 }
 0x1cd   :  { %249 = vadd.xlane.f32.xlu1 %v248_v44 }
 0x205   :  { %v234_v45 = vpop.permute.xlu2 %233 }
 0x206   :  { %v241_v46 = vsel %vm237_vm3, %v234_v45, 0.0 }
 0x207   :  { %242 = vadd.xlane.f32.xlu0 %v241_v46 }
 0x215   :  { %v232_v47 = vpop.permute.xlu1 %231 }
 0x216   :  { %v238_v48 = vsel %vm237_vm3, %v232_v47, 0.0 }
 0x217   :  { %239 = vadd.xlane.f32.xlu2 %v238_v48 }
 0x21f   :  { %252 = vadd.xlane.f32.xlu2 %v251_v35 }
 0x240   :  { %v250_v50 = vpop.xlane.xlu1 %249 }
 0x27a   :  { %v243_v55 = vpop.xlane.xlu0 %242 }
 0x28a   :  { %v240_v51 = vpop.xlane.xlu2 %239 }
 0x28b   :  { %v254_v52 = vadd.f32 %v250_v50, %v240_v51 }
 0x28d   :  { %v257_v53 = vadd.f32 %v386_v49, %v254_v52 }
 0x28f   :  { %v359_v54 = vmul.f32 -1.442695, %v257_v53 }
 0x291   :  { %387 = vpow2.f32 %v359_v54 }
 0x292   :  { %v253_v56 = vpop.xlane.xlu2 %252 }
 0x293   :  { %v255_v57 = vadd.f32 %v253_v56, %v243_v55 }
 0x295   :  { %v258_v58 = vadd.f32 %v386_v49, %v255_v57 }
 0x297   :  { %v388_v59 = vpop.eup %387  ;;  %v360_v60 = vmul.f32 -1.442695, %v258_v58 }
 0x298   :  { %v265_v61 = vadd.f32 1.0, %v388_v59 }
 0x299   :  { %389 = vpow2.f32 %v360_v60 }
 0x29a   :  { %391 = vrcp.f32 %v265_v61  ;;  %v278_v3 = vand.u32 2147483648, %v265_v61  ;;  %v276_v5 = vand.u32 2147483647, %v265_v61  ;;  %vm272_vm5 = vweird.f32 %v265_v61 }
 0x29c   :  { %v279_v8 = vor.u32 1.1754944e-38, %v278_v3  ;;  %vm277_vm8 = vcmp.eq.f32.partialorder %v276_v5, 8.507059e+37 }
 0x29f   :  { %v390_v62 = vpop.eup %389 }
 0x2a0   :  { %v392_v63 = vpop.eup %391  ;;  %v266_v0 = vadd.f32 1.0, %v390_v62 }
 0x2a1   :  { %v268_v1 = vmul.f32 %v392_v63, %v265_v61  ;;  %vm273_vm4 = vweird.f32 %v392_v63 }
 0x2a2   :  { %393 = vrcp.f32 %v266_v0  ;;  %vm274_vm7 = vmor %vm272_vm5, %vm273_vm4  ;;  %v293_v13 = vand.u32 2147483648, %v266_v0  ;;  %v291_v15 = vand.u32 2147483647, %v266_v0  ;;  %vm287_vm10 = vweird.f32 %v266_v0 }
 0x2a3   :  { %v269_v2 = vsub.f32 1.0, %v268_v1 }
 0x2a4   :  { %v294_v17 = vor.u32 1.1754944e-38, %v293_v13  ;;  %vm292_vm12 = vcmp.eq.f32.partialorder %v291_v15, 8.507059e+37 }
 0x2a5   :  { %v270_v4 = vmul.f32 %v392_v63, %v269_v2 }
 0x2a7   :  { %v271_v6 = vadd.f32 %v392_v63, %v270_v4 }
 0x2a8   :  { %v394_v7 = vpop.eup %393 }
 0x2a9   :  { %v275_v9 = vsel %vm274_vm7, %v392_v63, %v271_v6  ;;  %v283_v10 = vmul.f32 %v394_v7, %v266_v0  ;;  %vm288_vm9 = vweird.f32 %v394_v7 }
 0x2aa   :  { %v280_v11 = vsel %vm277_vm8, %v279_v8, %v275_v9  ;;  %vm289_vm11 = vmor %vm287_vm10, %vm288_vm9 }
 0x2ab   :  { %298 = vst.msk [vmem:[%s519_s3] sm:$0xff] %vm297_vm6, %v280_v11  ;;  %v284_v12 = vsub.f32 1.0, %v283_v10 }
 0x2ad   :  { %v285_v14 = vmul.f32 %v394_v7, %v284_v12 }
 0x2af   :  { %v286_v16 = vadd.f32 %v394_v7, %v285_v14 }
 0x2b1   :  { %v290_v18 = vsel %vm289_vm11, %v394_v7, %v286_v16 }
 0x2b2   :  { %v295_v19 = vsel %vm292_vm12, %v294_v17, %v290_v18 }
 0x2b3   :  { %299 = vst.msk [vmem:[%s519_s3 + $0x8] sm:$0xff] %vm297_vm6, %v295_v19 }
 0x2b4   :  { %304 = vsyncpa [#allocation3], 1 }
 0x2b5   :  { %305 = vsyncpa [#allocation5], 1 }

</bundles_post_ra>
